<compile_context>
chip_gen: v7x
topology: tpu7x:2x2x1
jax: 0.10.0
libtpu: 0.0.40
codegen_flags: <defaults>
</compile_context>

<pallas_src>
import functools

import jax
import jax.numpy as jnp
from jax.experimental import pallas as pl
from jax.experimental.pallas import tpu as pltpu


def _round_up(x, m):
    return ((x + m - 1) // m) * m


def _self_output_kernel(x_ref, w_ref, b_ref, res_ref, g_ref, beta_ref, o_ref,
                        *, eps, compute_dtype):
    # Fused: dense matmul + bias + residual add + LayerNorm, all in VMEM.
    x = x_ref[...]
    if compute_dtype is not None:
        # Cast on-chip (free next to the MXU); avoids an extra HBM pass over x.
        x = x.astype(compute_dtype)
    h = jnp.dot(x, w_ref[...], preferred_element_type=jnp.float32)   # MXU, f32 acc
    h = h + b_ref[...].astype(jnp.float32)                           # (1,H) bias
    h = h + res_ref[...].astype(jnp.float32)                         # residual

    # Two-pass LayerNorm stats (numerically matches torch.nn.LayerNorm).
    inv_h = 1.0 / h.shape[-1]
    mean = jnp.sum(h, axis=-1, keepdims=True) * inv_h
    centered = h - mean
    var = jnp.sum(centered * centered, axis=-1, keepdims=True) * inv_h
    normed = centered * jax.lax.rsqrt(var + eps)

    out = normed * g_ref[...].astype(jnp.float32) + beta_ref[...].astype(jnp.float32)
    o_ref[...] = out.astype(o_ref.dtype)


def roformer_self_output(hidden_states, input_tensor, w, b, gamma, beta,
                         *, eps=1e-12, tile_m=512, matmul_dtype=None):
    """Fused RoFormerSelfOutput forward (eval mode: dropout == identity).

    hidden_states: (M, H) self-attention output
    input_tensor:  (M, H) residual input
    w:             (H, H) = PyTorch Linear.weight.T
    b, gamma, beta: (H,)
    matmul_dtype:  optional dtype (e.g. jnp.bfloat16) for the MXU operands.
                   Only the weight is pre-cast in the wrapper; activations are
                   cast on-chip inside the kernel (f32 accumulation; the
                   bias/residual/LayerNorm epilogue stays in f32).
    """
    M, K = hidden_states.shape
    H = w.shape[1]
    out_dtype = input_tensor.dtype

    # Only the small, reused weight is cast ahead of time (read once per call).
    w_mm = w.astype(matmul_dtype) if matmul_dtype is not None else w

    x_is = jnp.dtype(hidden_states.dtype).itemsize
    w_is = jnp.dtype(w_mm.dtype).itemsize
    res_is = jnp.dtype(input_tensor.dtype).itemsize
    out_is = jnp.dtype(out_dtype).itemsize

    # Row tile: large for MXU efficiency / per-step overhead amortization, but
    # capped so the row grid has at least 2 steps (lets "parallel" shard rows
    # across both TensorCores on v7x).
    row_align = 8
    tm = min(tile_m, _round_up(pl.cdiv(M, 2), row_align))
    tm = max(row_align, _round_up(tm, row_align))

    # VMEM footprint: double-buffered x / residual / output tiles, a
    # single-buffered resident weight, plus f32 epilogue temporaries.
    def _footprint(t):
        return (2 * t * K * x_is          # x row tile (2 bufs)
                + 2 * t * H * res_is      # residual row tile (2 bufs)
                + 2 * t * H * out_is      # output row tile (2 bufs)
                + K * H * w_is            # resident weight (Buffered(1))
                + 3 * H * 4               # bias / gamma / beta
                + 4 * t * H * 4)          # f32 intermediates (estimate)

    VMEM_BUDGET = 48 * 1024 * 1024        # <= ~48 MiB so v7x (64 MiB) keeps headroom
    while tm > row_align and _footprint(tm) > VMEM_BUDGET:
        tm = max(row_align, _round_up(tm // 2, row_align))
    # TODO(synk): for very large hidden sizes (f32 weight >= ~16 MiB on v7x),
    # add an innermost "arbitrary" K grid axis with an f32 accumulator scratch
    # instead of shrinking tm; not needed at these shapes.
    vmem_limit = min(VMEM_BUDGET, max(32 * 1024 * 1024, int(_footprint(tm) * 1.25)))

    grid_m = pl.cdiv(M, tm)               # partial last block is masked by Pallas

    b2 = b.reshape(1, H)
    g2 = gamma.reshape(1, H)
    be2 = beta.reshape(1, H)

    kernel = functools.partial(_self_output_kernel, eps=eps,
                               compute_dtype=matmul_dtype)

    resident = pl.Buffered(1)             # constant block index -> 1 buffer is enough

    out = pl.pallas_call(
        kernel,
        out_shape=jax.ShapeDtypeStruct((M, H), out_dtype),
        grid_spec=pltpu.PrefetchScalarGridSpec(
            num_scalar_prefetch=0,
            grid=(grid_m,),
            in_specs=[
                pl.BlockSpec((tm, K), lambda i: (i, 0)),                        # x row tile
                pl.BlockSpec((K, H), lambda i: (0, 0), pipeline_mode=resident),  # weight
                pl.BlockSpec((1, H), lambda i: (0, 0), pipeline_mode=resident),  # bias
                pl.BlockSpec((tm, H), lambda i: (i, 0)),                        # residual tile
                pl.BlockSpec((1, H), lambda i: (0, 0), pipeline_mode=resident),  # LN gamma
                pl.BlockSpec((1, H), lambda i: (0, 0), pipeline_mode=resident),  # LN beta
            ],
            out_specs=pl.BlockSpec((tm, H), lambda i: (i, 0)),
        ),
        compiler_params=pltpu.CompilerParams(
            dimension_semantics=("parallel",),
            vmem_limit_bytes=vmem_limit,
        ),
    )(hidden_states, w_mm, b2, input_tensor, g2, be2)

    return out


def _reference(hidden_states, input_tensor, w, b, gamma, beta, eps=1e-12):
    h = hidden_states @ w + b
    h = h + input_tensor
    mean = jnp.mean(h, axis=-1, keepdims=True)
    var = jnp.mean((h - mean) ** 2, axis=-1, keepdims=True)
    return (h - mean) / jnp.sqrt(var + eps) * gamma + beta


if __name__ == "__main__":
    # Small shapes consistent with the module (hidden_size -> hidden_size).
    batch, seq = 2, 8
    hidden_size = 128
    eps = 1e-12

    key = jax.random.PRNGKey(0)
    k1, k2, k3, k4, k5 = jax.random.split(key, 5)

    M = batch * seq
    hidden_states = jax.random.normal(k1, (M, hidden_size), dtype=jnp.float32)
    input_tensor = jax.random.normal(k2, (M, hidden_size), dtype=jnp.float32)

    # Deterministic synthetic parameters (no checkpoint load).
    w = jax.random.normal(k3, (hidden_size, hidden_size),
                          dtype=jnp.float32) * 0.02          # Linear.weight.T
    b = jax.random.normal(k4, (hidden_size,), dtype=jnp.float32) * 0.02
    gamma = 1.0 + 0.1 * jax.random.normal(k5, (hidden_size,), dtype=jnp.float32)
    beta = jnp.zeros((hidden_size,), dtype=jnp.float32)

    # TODO(synk): dropout is identity in eval mode; training-mode dropout (RNG
    # mask) is intentionally not implemented here.

    # 1) f32 path, M divides the tile (grid of 2 row steps).
    out = roformer_self_output(hidden_states, input_tensor, w, b, gamma, beta,
                               eps=eps)
    out = jax.block_until_ready(out)
    ref = _reference(hidden_states, input_tensor, w, b, gamma, beta, eps=eps)
    assert out.shape == (M, hidden_size)
    assert jnp.allclose(out, ref, atol=1e-4, rtol=1e-4), "mismatch vs reference"

    # 2) ragged M (exercises the partial-last-block masking path, no jnp.pad).
    M2 = 26
    hs2 = jax.random.normal(jax.random.PRNGKey(1), (M2, hidden_size),
                            dtype=jnp.float32)
    res2 = jax.random.normal(jax.random.PRNGKey(2), (M2, hidden_size),
                             dtype=jnp.float32)
    out2 = roformer_self_output(hs2, res2, w, b, gamma, beta, eps=eps)
    out2 = jax.block_until_ready(out2)
    ref2 = _reference(hs2, res2, w, b, gamma, beta, eps=eps)
    assert out2.shape == (M2, hidden_size)
    assert jnp.allclose(out2, ref2, atol=1e-4, rtol=1e-4), "ragged mismatch"

    # 3) bf16 MXU-operand path (weight pre-cast, activations cast in-kernel);
    #    compared against the f32 reference with bf16-appropriate tolerance.
    out_bf16 = roformer_self_output(hidden_states, input_tensor, w, b, gamma,
                                    beta, eps=eps, matmul_dtype=jnp.bfloat16)
    out_bf16 = jax.block_until_ready(out_bf16)
    assert out_bf16.shape == (M, hidden_size)
    assert bool(jnp.isfinite(out_bf16).all()), "bf16 path produced non-finite"
    assert jnp.allclose(out_bf16, ref, atol=2e-2, rtol=2e-2), "bf16 mismatch"

    print("KERNEL_OK")
</pallas_src>

<mosaic_0001>
module attributes {stable_mosaic.version = 11 : i64} {
  func.func @_self_output_kernel(%arg0: i32, %arg1: memref<8x128xf32, #tpu.memory_space<vmem>>, %arg2: memref<128x128xf32, #tpu.memory_space<vmem>>, %arg3: memref<1x128xf32, #tpu.memory_space<vmem>>, %arg4: memref<8x128xf32, #tpu.memory_space<vmem>>, %arg5: memref<1x128xf32, #tpu.memory_space<vmem>>, %arg6: memref<1x128xf32, #tpu.memory_space<vmem>>, %arg7: memref<8x128xf32, #tpu.memory_space<vmem>>) attributes {dimension_semantics = [#tpu.dimension_semantics<parallel>], iteration_bounds = array<i64: 2>, scalar_prefetch = 0 : i64, scratch_operands = 0 : i64, tpu.core_type = #tpu.core_type<tc>, window_params = [{transform_indices = @transform_0, window_bounds = array<i64: 8, 128>}, {pipeline_mode = #tpu.pipeline_mode<synchronous>, transform_indices = @transform_1, window_bounds = array<i64: 128, 128>}, {pipeline_mode = #tpu.pipeline_mode<synchronous>, transform_indices = @transform_2, window_bounds = array<i64: 1, 128>}, {transform_indices = @transform_3, window_bounds = array<i64: 8, 128>}, {pipeline_mode = #tpu.pipeline_mode<synchronous>, transform_indices = @transform_4, window_bounds = array<i64: 1, 128>}, {pipeline_mode = #tpu.pipeline_mode<synchronous>, transform_indices = @transform_5, window_bounds = array<i64: 1, 128>}, {transform_indices = @transform_6, window_bounds = array<i64: 8, 128>}]} {
    %c0 = arith.constant 0 : index
    %c0_0 = arith.constant 0 : index
    %0 = vector.load %arg1[%c0, %c0_0] : memref<8x128xf32, #tpu.memory_space<vmem>>, vector<8x128xf32>
    %c0_1 = arith.constant 0 : index
    %c0_2 = arith.constant 0 : index
    %1 = vector.load %arg2[%c0_1, %c0_2] : memref<128x128xf32, #tpu.memory_space<vmem>>, vector<128x128xf32>
    %cst = arith.constant dense<0.000000e+00> : vector<8x128xf32>
    %2 = tpu.matmul %0, %1, %cst {dimension_numbers = #tpu.dot_dimension_numbers<[1], [0], [0], [1], [0, 0, 1, 1], [], []>} : vector<8x128xf32>, vector<128x128xf32>, vector<8x128xf32> -> vector<8x128xf32>
    %c0_3 = arith.constant 0 : index
    %c0_4 = arith.constant 0 : index
    %3 = vector.load %arg3[%c0_3, %c0_4] : memref<1x128xf32, #tpu.memory_space<vmem>>, vector<1x128xf32>
    %4 = vector.broadcast %3 : vector<1x128xf32> to vector<8x128xf32>
    %5 = arith.addf %2, %4 : vector<8x128xf32>
    %c0_5 = arith.constant 0 : index
    %c0_6 = arith.constant 0 : index
    %6 = vector.load %arg4[%c0_5, %c0_6] : memref<8x128xf32, #tpu.memory_space<vmem>>, vector<8x128xf32>
    %7 = arith.addf %5, %6 : vector<8x128xf32>
    %cst_7 = arith.constant dense<0.000000e+00> : vector<8xf32>
    %8 = vector.multi_reduction <add>, %7, %cst_7 [1] : vector<8x128xf32> to vector<8xf32>
    %9 = vector.shape_cast %8 : vector<8xf32> to vector<8x1xf32>
    %cst_8 = arith.constant 7.812500e-03 : f32
    %10 = vector.broadcast %cst_8 : f32 to vector<8x1xf32>
    %11 = arith.mulf %9, %10 : vector<8x1xf32>
    %12 = vector.broadcast %11 : vector<8x1xf32> to vector<8x128xf32>
    %13 = arith.subf %7, %12 : vector<8x128xf32>
    %14 = arith.mulf %13, %13 : vector<8x128xf32>
    %cst_9 = arith.constant dense<0.000000e+00> : vector<8xf32>
    %15 = vector.multi_reduction <add>, %14, %cst_9 [1] : vector<8x128xf32> to vector<8xf32>
    %16 = vector.shape_cast %15 : vector<8xf32> to vector<8x1xf32>
    %cst_10 = arith.constant 7.812500e-03 : f32
    %17 = vector.broadcast %cst_10 : f32 to vector<8x1xf32>
    %18 = arith.mulf %16, %17 : vector<8x1xf32>
    %cst_11 = arith.constant 9.99999996E-13 : f32
    %19 = vector.broadcast %cst_11 : f32 to vector<8x1xf32>
    %20 = arith.addf %18, %19 : vector<8x1xf32>
    %21 = math.rsqrt %20 : vector<8x1xf32>
    %22 = vector.broadcast %21 : vector<8x1xf32> to vector<8x128xf32>
    %23 = arith.mulf %13, %22 : vector<8x128xf32>
    %c0_12 = arith.constant 0 : index
    %c0_13 = arith.constant 0 : index
    %24 = vector.load %arg5[%c0_12, %c0_13] : memref<1x128xf32, #tpu.memory_space<vmem>>, vector<1x128xf32>
    %25 = vector.broadcast %24 : vector<1x128xf32> to vector<8x128xf32>
    %26 = arith.mulf %23, %25 : vector<8x128xf32>
    %c0_14 = arith.constant 0 : index
    %c0_15 = arith.constant 0 : index
    %27 = vector.load %arg6[%c0_14, %c0_15] : memref<1x128xf32, #tpu.memory_space<vmem>>, vector<1x128xf32>
    %28 = vector.broadcast %27 : vector<1x128xf32> to vector<8x128xf32>
    %29 = arith.addf %26, %28 : vector<8x128xf32>
    %c0_16 = arith.constant 0 : index
    %c0_17 = arith.constant 0 : index
    %30 = vector.load %arg7[%c0_16, %c0_17] : memref<8x128xf32, #tpu.memory_space<vmem>>, vector<8x128xf32>
    tpu.vector_store %arg7[%c0_16, %c0_17], %29 {strides = array<i32>} : memref<8x128xf32, #tpu.memory_space<vmem>>, vector<8x128xf32>,
    return
  }
  func.func @transform_0(%arg0: i32) -> (i32, i32) {
    %c0_i32 = arith.constant 0 : i32
    %c0_i32_0 = arith.constant 0 : i32
    return %arg0, %c0_i32 : i32, i32
  }
  func.func @transform_1(%arg0: i32) -> (i32, i32) {
    %c0_i32 = arith.constant 0 : i32
    %c0_i32_0 = arith.constant 0 : i32
    %c0_i32_1 = arith.constant 0 : i32
    return %c0_i32, %c0_i32_0 : i32, i32
  }
  func.func @transform_2(%arg0: i32) -> (i32, i32) {
    %c0_i32 = arith.constant 0 : i32
    %c0_i32_0 = arith.constant 0 : i32
    %c0_i32_1 = arith.constant 0 : i32
    return %c0_i32, %c0_i32_0 : i32, i32
  }
  func.func @transform_3(%arg0: i32) -> (i32, i32) {
    %c0_i32 = arith.constant 0 : i32
    %c0_i32_0 = arith.constant 0 : i32
    return %arg0, %c0_i32 : i32, i32
  }
  func.func @transform_4(%arg0: i32) -> (i32, i32) {
    %c0_i32 = arith.constant 0 : i32
    %c0_i32_0 = arith.constant 0 : i32
    %c0_i32_1 = arith.constant 0 : i32
    return %c0_i32, %c0_i32_0 : i32, i32
  }
  func.func @transform_5(%arg0: i32) -> (i32, i32) {
    %c0_i32 = arith.constant 0 : i32
    %c0_i32_0 = arith.constant 0 : i32
    %c0_i32_1 = arith.constant 0 : i32
    return %c0_i32, %c0_i32_0 : i32, i32
  }
  func.func @transform_6(%arg0: i32) -> (i32, i32) {
    %c0_i32 = arith.constant 0 : i32
    %c0_i32_0 = arith.constant 0 : i32
    return %arg0, %c0_i32 : i32, i32
  }
}

</mosaic_0001>

<bundles_post_ra>
// kernel: tpu_custom_call.1
= control target key start
LH: loop header
LB: loop body
LE: loop exit
PB: predicated region body
PF: predicated region fallthrough
CT: control target
= control target key end

     0   :  { %s1186_s0 = inlined_call_operand.hbm [shape: f32[16,128], index: 0, kind: input, shape index: {}]   ;;  %s1187_s1 = inlined_call_operand.hbm [shape: f32[128,128], index: 1, kind: input, shape index: {}]   ;;  %s1188_s2 = inlined_call_operand.vmem [shape: f32[1,128], index: 2, kind: input, shape index: {}]   ;;  %s1189_s3 = inlined_call_operand.hbm [shape: f32[16,128], index: 3, kind: input, shape index: {}]   ;;  %s1190_s4 = inlined_call_operand.vmem [shape: f32[1,128], index: 4, kind: input, shape index: {}]   ;;  %s1191_s5 = inlined_call_operand.vmem [shape: f32[1,128], index: 5, kind: input, shape index: {}]   ;;  %s1192_s6 = inlined_call_operand.hbm [shape: f32[16,128], index: 6, kind: output, shape index: {}]  }
   0x1   :  { %1198 = sst [smem:[#allocation13_spill]] %s1186_s0 }
   0x2   :  { %1199 = sst [smem:[#allocation14_spill]] %s1189_s3 }
   0x3   :  { %11 = vsyncpa [#allocation3], 0 }
   0x4   :  { %13 = vsyncpa [#allocation3 + $0x1], 0 }
   0x5   :  { %14 = vsyncpa [#allocation6], 0 }
   0x6   :  { %15 = vsyncpa [#allocation4], 0 }
   0x7   :  { %17 = vsyncpa [#allocation4 + $0x1], 0  ;;  %s927_s21 = smov 0   ;;  %s929_s22 = smov 0  }
   0x8   :  { %s931_s23 = smov 0   ;;  %s933_s24 = smov 0  }
   0x9 LB: > { %s948_s25 = sadd.s32 1, %s881_s24   ;;  %s30_s26 = sadd.s32 1, %s877_s23  ;;  %s881_s24 = sphi %s933_s24, %s1219_s24   ;;  %s877_s23 = sphi %s931_s23, %s1218_s23   ;;  %s873_s22 = sphi %s929_s22, %s1217_s22   ;;  %s869_s21 = sphi %s927_s21, %s1216_s21  }
   0xa   : > { %s27_s27 = ssub.s32 %s881_s24, %s948_s25  ;;  %p37_p0 = scmp.ne.s32.totalorder %s877_s23, %s873_s22 }
   0xb   : > { %p28_p1 = scmp.eq.s32.totalorder %s27_s27, 0  ;;  %p38_p2 = scmp.eq.s32.totalorder %s881_s24, 0 }
   0xc   : > { %p676_p4 = scmp.lt.s32.totalorder %s881_s24, 2  ;;  %s225_s29 = sand.u32 1, %s881_s24  }
   0xd   : > { %s959_s28 = scalar_select %p28_p1, %s877_s23, %s30_s26  }
   0xe   : > { %p39_p5 = por %p38_p2, %p37_p0  ;;  %s227_s30 = sand.u32 1, %s877_s23  }
   0xf   : > { %s966_s7 = sshll.u32 %s227_s30, 3  ;;  %s559_s8 = sshll.u32 %s881_s24, 7 }
  0x10   : > { %s1200_s0 = sld [smem:[#allocation13_spill]]  ;;  %s229_s12 = scalar_lea.vmem [#allocation2], %s966_s7 }
  0x11   : > { %s236_s13 = sshll.u32 %s229_s12, 4  ;;  %p977_p6 = pnand %p676_p4, %p39_p5  ;;  %s981_s13 = int_to_ptr.vmem [resolvable:$true] %s236_s13 }
  0x12   : > { %s983_s15 = scalar_lea.sflag [#allocation3], %s225_s29 }
  0x13   : > { %p721_p8 = pneg %p977_p6 }
  0x16   : > { %s974_s11 = scalar_lea.hbm %s1200_s0, %s559_s8  ;;  %s724_s19 = scalar_lea.hbm %s1200_s0, 256 }
  0x17   : > { %s719_s16 = scalar_lea.hbm %s974_s11, 128  ;;  %p725_p11 = scmp.lt.u32.totalorder %s974_s11, %s1200_s0 }
  0x18   : > { %p720_p7 = scmp.ne.s32.totalorder %s974_s11, %s719_s16  ;;  %p726_p12 = scmp.lt.u32.totalorder %s724_s19, %s719_s16 }
  0x19   : > { %p728_p1 = scmp.lt.u32.totalorder %s719_s16, %s974_s11 }
  0x1a   : > { %p722_p9 = pnand %p721_p8, %p720_p7  ;;  %p727_p13 = por %p726_p12, %p725_p11 }
  0x1c   : > { %p723_p10 = pneg %p722_p9  ;;  %p729_p2 = por %p728_p1, %p727_p13 }
  0x1e   : > { %p730_p4 = pnand %p729_p2, %p723_p10 }
  0x20   : > { %733 = shalt.err (!%p730_p4)
}
  0x21   : > { %s734_s27 = scalar_lea.vmem %s981_s13, 128  ;;  %s883_s29 = smov [#allocation2]  }
  0x22   : > { %p735_p5 = scmp.ne.s32.totalorder %s981_s13, %s734_s27  ;;  %s739_s30 = sshll.u32 %s883_s29, 4  ;;  %s740_s30 = int_to_ptr.vmem [resolvable:$false] %s739_s30 }
  0x23   : > { %s741_s9 = scalar_lea.vmem %s740_s30, 256  ;;  %p742_p3 = scmp.lt.s32.totalorder %s981_s13, %s740_s30 }
  0x24   : > { %p737_p7 = pnand %p735_p5, %p721_p8  ;;  %p743_p11 = scmp.lt.s32.totalorder %s741_s9, %s734_s27 }
  0x26   : > { %p738_p9 = pneg %p737_p7  ;;  %p744_p12 = por %p743_p11, %p742_p3 }
  0x28   : > { %p745_p13 = pnand %p744_p12, %p738_p9 }
  0x2a   : > { %748 = shalt.err (!%p745_p13)
}
  0x2b   : > { %667 = dma.hbm_to_vmem [thread:$0]  (!%p977_p6), %s974_s11, 128, %s981_s13, %s983_s15  }
  0x2c   : > { %s1012_s10 = sadd.s32 4294967295, %s881_s24   ;;  %s554_s12 = sadd.s32 4294967294, %s881_s24  }
  0x2d   : > { %p43_p3 = scmp.ne.s32.totalorder %s873_s22, %s869_s21  ;;  %p1193_p10 = scmp.eq.s32.totalorder %s1012_s10, 0 }
  0x2e   : > { %p177_p1 = scmp.eq.s32.totalorder %s1012_s10, 1  ;;  %p183_p2 = scmp.eq.s32.totalorder %s554_s12, 1 }
  0x2f   : > { %p1021_p4 = por %p1193_p10, %p43_p3  ;;  %p555_p5 = scmp.ge.s32.totalorder %s881_s24, 1 }
  0x30   : > { %p1029_p7 = por %p177_p1, %p37_p0  ;;  %p1033_p9 = por %p183_p2, %p43_p3 }
  0x31   : > { %s1202_s16 = scalar_select %p1021_p4, 1, 0 }
  0x32   : > { %s1203_s11 = scalar_select %p1029_p7, 1, 0 }
  0x33   : > { %s1204_s13 = scalar_select %p1033_p9, 1, 0 }
  0x34   : > { %p190_p11 = scmp.lt.s32.totalorder %s881_s24, 3  ;;  %s884_s18 = smov [#allocation5]  }
  0x35   : > { %s202_s19 = sshll.u32 %s884_s18, 4  ;;  %s1206_s3 = sld [smem:[#allocation14_spill]]  ;;  %s1052_s19 = int_to_ptr.vmem [resolvable:$true] %s202_s19 }
  0x36   : > { %p1038_p12 = pnand %p555_p5, %p190_p11  ;;  %s247_s29 = scalar_lea.vmem [#allocation7], %s966_s7 }
  0x37   : > { %s254_s30 = sshll.u32 %s247_s29, 4  ;;  %s255_s30 = int_to_ptr.vmem [resolvable:$true] %s254_s30 }
  0x38   : > { %s1205_s17 = scalar_select %p1038_p12, 1, 0 }
  0x39   : > { %p660_p0 = pneg %p1038_p12 }
  0x3b   : > { %s1047_s27 = scalar_lea.hbm %s1206_s3, %s559_s8  ;;  %p1056_p13 = pnand %p660_p0, %p1193_p10 }
  0x3c   : > { %s749_s12 = scalar_lea.hbm %s1047_s27, 128  ;;  %s754_s20 = scalar_lea.hbm %s1206_s3, 256 }
  0x3d   : > { %s1207_s9 = scalar_select %p1056_p13, 1, 0 }
  0x3e   : > { %p750_p3 = scmp.ne.s32.totalorder %s1047_s27, %s749_s12  ;;  %p755_p5 = scmp.lt.u32.totalorder %s1047_s27, %s1206_s3 }
  0x3f   : > { %p756_p11 = scmp.lt.u32.totalorder %s754_s20, %s749_s12  ;;  %p758_p0 = scmp.lt.u32.totalorder %s749_s12, %s1047_s27 }
  0x40   : > { %p752_p1 = pnand %p750_p3, %p721_p8 }
  0x41   : > { %p757_p9 = por %p756_p11, %p755_p5 }
  0x42   : > { %p753_p2 = pneg %p752_p1 }
  0x43   : > { %p759_p10 = por %p758_p0, %p757_p9 }
  0x45   : > { %p760_p7 = pnand %p759_p10, %p753_p2 }
  0x47   : > { %763 = shalt.err (!%p760_p7)
}
  0x48   : > { %s764_s29 = scalar_lea.vmem %s255_s30, 128  ;;  %s885_s0 = smov [#allocation7]  }
  0x49   : > { %p765_p4 = scmp.ne.s32.totalorder %s255_s30, %s764_s29  ;;  %s769_s8 = sshll.u32 %s885_s0, 4  ;;  %s770_s8 = int_to_ptr.vmem [resolvable:$false] %s769_s8 }
  0x4a   : > { %s771_s18 = scalar_lea.vmem %s770_s8, 256  ;;  %p772_p12 = scmp.lt.s32.totalorder %s255_s30, %s770_s8 }
  0x4b   : > { %p767_p3 = pnand %p765_p4, %p721_p8  ;;  %p773_p13 = scmp.lt.s32.totalorder %s771_s18, %s764_s29 }
  0x4d   : > { %p768_p1 = pneg %p767_p3  ;;  %p774_p5 = por %p773_p13, %p772_p12 }
  0x4f   : > { %p775_p11 = pnand %p774_p5, %p768_p1 }
  0x51   : > { %778 = shalt.err (!%p775_p11)
}
  0x52   : > { %670 = dma.hbm_to_vmem [thread:$0]  (!%p977_p6), %s1047_s27, 128, %s255_s30, %s983_s15  }
  0x53   : > { %s779_s7 = scalar_lea.hbm %s1187_s1, 2048  ;;  %p1208_p10 = scmp.ne.s32.totalorder %s1207_s9, 0 }
  0x54   : > { %p780_p8 = scmp.ne.s32.totalorder %s1187_s1, %s779_s7  ;;  %p786_p12 = scmp.lt.u32.totalorder %s779_s7, %s1187_s1 }
  0x55   : > { %p781_p4 = pneg %p1208_p10 }
  0x57   : > { %p782_p7 = pnand %p781_p4, %p780_p8 }
  0x59   : > { %p783_p9 = pneg %p782_p7 }
  0x5b   : > { %p788_p13 = pnand %p786_p12, %p783_p9 }
  0x5d   : > { %791 = shalt.err (!%p788_p13)
}
  0x5e   : > { %s792_s14 = scalar_lea.vmem %s1052_s19, 2048  ;;  %p800_p3 = scmp.lt.s32.totalorder %s1052_s19, %s1052_s19 }
  0x5f   : > { %p793_p6 = scmp.ne.s32.totalorder %s1052_s19, %s792_s14  ;;  %p801_p1 = scmp.lt.s32.totalorder %s792_s14, %s792_s14 }
  0x61   : > { %p795_p2 = pnand %p793_p6, %p781_p4  ;;  %p802_p5 = por %p801_p1, %p800_p3 }
  0x63   : > { %p796_p0 = pneg %p795_p2 }
  0x65   : > { %p803_p11 = pnand %p802_p5, %p796_p0 }
  0x67   : > { %806 = shalt.err (!%p803_p11)
}
  0x68   : > { %s886_s3 = smov 128   ;;  %s887_s15 = smov 8  }
  0x69   : > { %663 = dma.hbm_to_vmem [thread:$0]  (!%p1208_p10), %s1187_s1, 2048, %s1052_s19, [#allocation6], %s886_s3, %s886_s3, %s887_s15  }
  0x6a   : > { %p1209_p8 = scmp.ne.s32.totalorder %s1205_s17, 0 }
  0x6b   : > { %s265_s8 = sand.u32 (!%p1209_p8), 1, %s1012_s10   ;;  %s267_s18 = sand.u32 (!%p1209_p8), 1, %s873_s22  }
  0x6c   : > { %263 = sbr.rel (%p1209_p8) target bundleno = 697 (0x2b9), region = 44  ;;  %s1107_s12 = sshll.u32 (!%p1209_p8), %s267_s18, 3 }
  0x6d   : > { %s266_s20 = scalar_lea.sflag (!%p1209_p8), [#allocation3], %s265_s8  ;;  %s269_s7 = scalar_lea.vmem (!%p1209_p8), [#allocation2], %s1107_s12 }
  0x6e   : > { %p1210_p4 = scmp.ne.s32.totalorder (!%p1209_p8), %s1202_s16, 0 }
  0x73   : > { %852 = dma.done.wait (%p1210_p4), %s266_s20, 128  }
  0x74   : > { %854 = vsyncadd (%p1210_p4), %s266_s20, 4294967168  ;;  %p1211_p10 = scmp.eq.s32.totalorder %s1012_s10, 0 }
  0x76   : > { %856 = dma.done.wait (%p1211_p10), [#allocation6], 2048   ;;  %p1212_p7 = pmov %p1211_p10 }
  0x77   : > { %s282_s17 = scalar_lea.vmem [#allocation7], %s1107_s12 }
  0x78   : > { %858 = vsyncadd (%p1212_p7), [#allocation6], 4294965248 }
  0x79   : > { %860 = dma.done.wait (%p1210_p4), %s266_s20, 128  }
  0x7a   : > { %862 = vsyncadd (%p1210_p4), %s266_s20, 4294967168  ;;  %v888_v0 = vmov 0.0|0.0   ;;  %vm889_vm0 = vmmov 0   ;;  %v890_v1 = vmov 0.0   ;;  %v317_v2 = vld [vmem:[#allocation5] sm:$0xff]  ;;  %v318_v3 = vld [vmem:[#allocation5 + $0x8] sm:$0xff] }
  0x7b   : > { %626 = vmatprep.subr.bf16.mxu0 %v888_v0  ;;  %623 = vmatprep.mubr.msk.f32.mxu0 %vm889_vm0, %v890_v1  ;;  %v319_v4 = vld [vmem:[#allocation5 + $0x10] sm:$0xff]  ;;  %v627_v5 = vpack.c.bf16 %v318_v3, %v317_v2  ;;  %v320_v6 = vld [vmem:[#allocation5 + $0x18] sm:$0xff]  ;;  %v321_v8 = vld [vmem:[#allocation5 + $0x20] sm:$0xff]  ;;  %s571_s14 = sshll.u32 %s1012_s10, 7  ;;  %s315_s3 = scalar_lea.vmem [#allocation8], %s1107_s12 }
  0x7c   : > { %v630_v7 = vpack.c.bf16 %v320_v6, %v319_v4  ;;  %v322_v9 = vld [vmem:[#allocation5 + $0x28] sm:$0xff]  ;;  %v323_v11 = vld [vmem:[#allocation5 + $0x30] sm:$0xff]  ;;  %v324_v12 = vld [vmem:[#allocation5 + $0x38] sm:$0xff]  ;;  %s454_s15 = sshll.u32 %s315_s3, 4  ;;  %s1141_s8 = scalar_lea.hbm %s1192_s6, %s571_s14  ;;  %s1143_s15 = int_to_ptr.vmem [resolvable:$true] %s454_s15 }
  0x7d   : > { %628 = vmatpush3.bf16.msra.mxu0 %v627_v5  ;;  %v633_v10 = vpack.c.bf16 %v322_v9, %v321_v8  ;;  %v636_v13 = vpack.c.bf16 %v324_v12, %v323_v11  ;;  %v325_v14 = vld [vmem:[#allocation5 + $0x40] sm:$0xff]  ;;  %v326_v15 = vld [vmem:[#allocation5 + $0x48] sm:$0xff]  ;;  %v327_v17 = vld [vmem:[#allocation5 + $0x50] sm:$0xff]  ;;  %s441_s20 = scalar_lea.sflag [#allocation4], %s267_s18  ;;  %p1213_p12 = scmp.ne.s32.totalorder %s1203_s11, 0 }
  0x7e   : > { %629 = vmatprep.subr.bf16.mxu0 %v888_v0  ;;  %v639_v16 = vpack.c.bf16 %v326_v15, %v325_v14  ;;  %v328_v18 = vld [vmem:[#allocation5 + $0x58] sm:$0xff]  ;;  %v329_v20 = vld [vmem:[#allocation5 + $0x60] sm:$0xff]  ;;  %v330_v21 = vld [vmem:[#allocation5 + $0x68] sm:$0xff]  ;;  %s891_s10 = smov [#allocation8]  }
  0x7f   : > { %v642_v19 = vpack.c.bf16 %v328_v18, %v327_v17  ;;  %v645_v22 = vpack.c.bf16 %v330_v21, %v329_v20  ;;  %v331_v23 = vld [vmem:[#allocation5 + $0x70] sm:$0xff]  ;;  %v332_v24 = vld [vmem:[#allocation5 + $0x78] sm:$0xff]  ;;  %v410_v29 = vld [vmem:[%s282_s17] sm:$0xff]  ;;  %s811_s12 = sshll.u32 %s891_s10, 4  ;;  %s812_s12 = int_to_ptr.vmem [resolvable:$false] %s811_s12 }
  0x80   : > { %v648_v25 = vpack.c.bf16 %v332_v24, %v331_v23  ;;  %v316_v26 = vld [vmem:[%s269_s7] sm:$0xff]  ;;  %s807_s7 = scalar_lea.vmem %s1143_s15, 128  ;;  %s813_s17 = scalar_lea.vmem %s812_s12, 256 }
  0x81   : > { %631 = vmatpush3.bf16.msra.mxu0 %v630_v7  ;;  %v567_v27 = vld [vmem:[%s1188_s2] ss:$0 sm:$0xff]  ;;  %p808_p9 = scmp.ne.s32.totalorder %s1143_s15, %s807_s7  ;;  %p814_p2 = scmp.lt.s32.totalorder %s1143_s15, %s812_s12 }
  0x82   : > { %632 = vmatprep.subr.bf16.mxu0 %v888_v0  ;;  %v568_v41 = vld [vmem:[%s1190_s4] ss:$0 sm:$0xff]  ;;  %p815_p0 = scmp.lt.s32.totalorder %s813_s17, %s807_s7 }
  0x83   : > { %v569_v43 = vld [vmem:[%s1191_s5] ss:$0 sm:$0xff]  ;;  %p809_p13 = pnand %p808_p9, %p1213_p12 }
  0x84   : > { %p816_p3 = por %p815_p0, %p814_p2 }
  0x85   : > { %634 = vmatpush3.bf16.msra.mxu0 %v633_v10  ;;  %p810_p6 = pneg %p809_p13 }
  0x86   : > { %635 = vmatprep.subr.bf16.mxu0 %v888_v0 }
  0x87   : > { %p817_p1 = pnand %p816_p3, %p810_p6 }
  0x89   : > { %637 = vmatpush3.bf16.msra.mxu0 %v636_v13 }
  0x8a   : > { %638 = vmatprep.subr.bf16.mxu0 %v888_v0 }
  0x8d   : > { %640 = vmatpush3.bf16.msra.mxu0 %v639_v16 }
  0x8e   : > { %641 = vmatprep.subr.bf16.mxu0 %v888_v0 }
  0x91   : > { %643 = vmatpush3.bf16.msra.mxu0 %v642_v19 }
  0x92   : > { %644 = vmatprep.subr.bf16.mxu0 %v888_v0 }
  0x95   : > { %646 = vmatpush3.bf16.msra.mxu0 %v645_v22 }
  0x96   : > { %647 = vmatprep.subr.bf16.mxu0 %v888_v0 }
  0x99   : > { %649 = vmatpush3.bf16.msra.mxu0 %v648_v25 }
  0x9c   : > { %624 = vmatmul.mubr.f32.vlgmr.msra.gmra.mrb[0].mxu0 %v316_v26 }
 0x16f   : > { %v406_v28 = vpop.f32.mrb[0].mxu0 }
 0x170   : > { %v407_v30 = vadd.f32 %v567_v27, %v406_v28  ;;  %v625_v31 = vpop.f32.mrb[1].mxu0 }
 0x172   : > { %v411_v32 = vadd.f32 %v410_v29, %v407_v30 }
 0x174   : > { %412 = vadd.xlane.f32.xlu0 %v411_v32 }
 0x201   : > { %v413_v33 = vpop.xlane.xlu0 %412 }
 0x202   : > { %v414_v34 = vmul.f32 0.0078125, %v413_v33 }
 0x204   : > { %v415_v35 = vsub.f32 %v411_v32, %v414_v34 }
 0x206   : > { %v416_v36 = vmul.f32 %v415_v35, %v415_v35 }
 0x208   : > { %417 = vadd.xlane.f32.xlu0 %v416_v36 }
 0x295   : > { %v418_v37 = vpop.xlane.xlu0 %417 }
 0x296   : > { %v419_v38 = vmul.f32 0.0078125, %v418_v37 }
 0x298   : > { %v420_v39 = vadd.f32 1e-12, %v419_v38 }
 0x29a   : > { %717 = vrsqrt.f32 %v420_v39 }
 0x2a4   : > { %v718_v40 = vpop.eup %717 }
 0x2a5   : > { %v422_v42 = vmul.f32 %v718_v40, %v415_v35 }
 0x2a7   : > { %v430_v44 = vmul.f32 %v568_v41, %v422_v42 }
 0x2a9   : > { %v438_v45 = vadd.f32 %v569_v43, %v430_v44 }
 0x2ab   : > { %439 = vst [vmem:[%s315_s3] sm:$0xff] %v438_v45 }
 0x2ac   : > { %820 = shalt.err (!%p817_p1)
}
 0x2ad   : > { %s821_s18 = scalar_lea.hbm %s1141_s8, 128  ;;  %s825_s9 = scalar_lea.hbm %s1192_s6, 256 }
 0x2ae   : > { %p822_p5 = scmp.ne.s32.totalorder %s1141_s8, %s821_s18  ;;  %p826_p4 = scmp.lt.u32.totalorder %s1141_s8, %s1192_s6 }
 0x2af   : > { %p827_p10 = scmp.lt.u32.totalorder %s825_s9, %s821_s18  ;;  %p829_p9 = scmp.lt.u32.totalorder %s821_s18, %s1141_s8 }
 0x2b0   : > { %p823_p11 = pnand %p822_p5, %p1213_p12 }
 0x2b1   : > { %p828_p7 = por %p827_p10, %p826_p4 }
 0x2b2   : > { %p824_p8 = pneg %p823_p11 }
 0x2b3   : > { %p830_p13 = por %p829_p9, %p828_p7 }
 0x2b5   : > { %p831_p6 = pnand %p830_p13, %p824_p8 }
 0x2b7   : > { %834 = shalt.err (!%p831_p6)
}
 0x2b8   : > { %658 = dma.vmem_to_hbm [thread:$0]  (%p1213_p12), %s1143_s15, 128, %s1141_s8, %s441_s20  }
 0x2b9 PF: > { %s466_s29 = sand.u32 1, %s869_s21   ;;  %p1214_p2 = scmp.ne.s32.totalorder %s1204_s13, 0 }
 0x2ba   : > { %p1215_p0 = scmp.ge.s32.totalorder %s881_s24, 2  ;;  %s467_s14 = scalar_lea.sflag [#allocation4], %s466_s29 }
 0x2bc   : > { %p672_p3 = pnand %p1215_p0, %p1214_p2 }
 0x2be   : > { %864 = dma.done.wait (!%p672_p3), %s467_s14, 128  }
 0x2bf   : > { %866 = vsyncadd (!%p672_p3), %s467_s14, 4294967168  ;;  %p20_p1 = scmp.ge.s32.totalorder %s948_s25, 4   ;;  %s1216_s21 = smov %s873_s22 }
 0x2c0   : > { %s1217_s22 = smov %s877_s23  ;;  %s1218_s23 = smov %s959_s28 }
 0x2c1   : > { %s1219_s24 = smov %s948_s25  ;;  %22 = sbr.rel (!%p20_p1) target bundleno = 9 (0x9), region = 104 }
 0x2c8   :  { %472 = vsyncpa [#allocation3], 1 }
 0x2c9   :  { %474 = vsyncpa [#allocation3 + $0x1], 1 }
 0x2ca   :  { %475 = vsyncpa [#allocation6], 1 }
 0x2cb   :  { %476 = vsyncpa [#allocation4], 1 }
 0x2cc   :  { %478 = vsyncpa [#allocation4 + $0x1], 1 }

</bundles_post_ra>
